<compile_context>
chip_gen: v7x
topology: tpu7x:2x2x1
jax: 0.10.0
libtpu: 0.0.40
codegen_flags: <defaults>
</compile_context>

<pallas_src>
import jax
import jax.numpy as jnp
from jax.experimental import pallas as pl
from jax.experimental.pallas import tpu as pltpu

EPS = 1e-5
NEG_BIG = -1e9   # beta for padded output columns -> softmax(pad col) == 0


def _ceil_to(x, m):
    return ((x + m - 1) // m) * m


# --------------------------------------------------------------------------- #
# Kernel
# --------------------------------------------------------------------------- #
def mlp_kernel(nb_ref, x_ref, w1_ref, w2_ref, w3_ref, gb_ref, o_ref, acc_ref):
    """Grid axis 0 tiles the layer-1 reduction (K); usually a single step.

    nb_ref  : SMEM scalar-prefetch ref, nb_ref[0] = real (unpadded) batch size.
    acc_ref : f32 VMEM accumulator for x @ w1.
    """
    k = pl.program_id(0)

    @pl.when(k == 0)
    def _():
        acc_ref[...] = jnp.zeros_like(acc_ref)

    # Layer-1 partial matmul: bf16 operands, f32 accumulation on the MXU.
    acc_ref[...] += jnp.dot(x_ref[...], w1_ref[...],
                            preferred_element_type=jnp.float32)

    @pl.when(k == pl.num_programs(0) - 1)
    def _():
        pad_b = acc_ref.shape[0]
        inner = acc_ref.shape[1]
        out_pad = o_ref.shape[1]

        b_real = nb_ref[0]                                  # scalar from SMEM
        inv_b = 1.0 / b_real.astype(jnp.float32)

        # Row mask: 1.0 for real batch rows, 0.0 for sublane-padding rows.
        row = jax.lax.broadcasted_iota(jnp.int32, (pad_b, 1), 0)
        mask = (row < b_real).astype(jnp.float32)

        def bn(h, gamma, beta):
            # Training-mode BatchNorm1d (biased variance, eps=1e-5) with the
            # affine folded into one per-feature scale/shift.  Two-pass
            # variance: mean first, then centered sum of squares.  Padded rows
            # of h are exactly zero, so the mean is correct over real rows;
            # centered padded rows are masked before squaring so they do not
            # pollute the variance.
            mu = jnp.sum(h, axis=0, keepdims=True) * inv_b
            c = (h - mu) * mask
            var = jnp.sum(c * c, axis=0, keepdims=True) * inv_b
            scale = gamma * jax.lax.rsqrt(var + EPS)
            shift = beta - mu * scale
            return h * scale + shift

        # Packed (6, Dmax) f32: rows 0-2 = gamma1..3, rows 3-5 = beta1..3.
        g1, be1 = gb_ref[0:1, :inner], gb_ref[3:4, :inner]
        g2, be2 = gb_ref[1:2, :inner], gb_ref[4:5, :inner]
        g3, be3 = gb_ref[2:3, :out_pad], gb_ref[5:6, :out_pad]

        # Layer 1: (Linear already accumulated) -> BN -> ReLU.  Zero padded rows
        # so the next layer's batch statistics stay exact.
        h = acc_ref[...]
        h = jnp.maximum(bn(h, g1, be1), 0.0) * mask

        # Layer 2: Linear -> BN -> ReLU (bf16 matmul operands, f32 accumulation).
        h = jnp.dot(h.astype(w2_ref.dtype), w2_ref[...],
                    preferred_element_type=jnp.float32)
        h = jnp.maximum(bn(h, g2, be2), 0.0) * mask

        # Layer 3: Linear -> BN (padded output columns: gamma=0, beta=-1e9).
        h = jnp.dot(h.astype(w3_ref.dtype), w3_ref[...],
                    preferred_element_type=jnp.float32)
        y = bn(h, g3, be3)

        # Softmax over features; padded columns contribute exp(~-1e9) == 0.
        m = jnp.max(y, axis=1, keepdims=True)
        e = jnp.exp(y - m)
        o_ref[...] = (e / jnp.sum(e, axis=1, keepdims=True)).astype(o_ref.dtype)


# --------------------------------------------------------------------------- #
# Host-side helpers
# --------------------------------------------------------------------------- #
def _vmem_budget_bytes():
    """Generation-aware scoped-VMEM budget (v7x: 64 MiB/TC, v5e/v6e: 128 MiB)."""
    try:
        cap = int(pltpu.get_tpu_info().vmem_capacity_bytes)
    except Exception:
        cap = 64 * 2**20            # conservative fallback (v7x per-TC size)
    return max(cap - 16 * 2**20, 32 * 2**20)


def prepare_params(params, *, matmul_dtype=jnp.bfloat16):
    """One-time weight preparation (hoisted out of the per-call path)."""
    k_in, inner = params["w1"].shape
    n_out = params["w3"].shape[1]
    k128 = _ceil_to(k_in, 128)
    out_pad = _ceil_to(n_out, 128)
    d_max = max(inner, out_pad)

    # Cast to bf16 first, then pad (no full f32 padded copies).
    w1 = jnp.zeros((k128, inner), matmul_dtype)
    w1 = w1.at[:k_in, :].set(params["w1"].astype(matmul_dtype))
    w2 = params["w2"].astype(matmul_dtype)
    w3 = jnp.zeros((inner, out_pad), matmul_dtype)
    w3 = w3.at[:, :n_out].set(params["w3"].astype(matmul_dtype))

    # Pack all gammas/betas into one small f32 array (single DMA in-kernel).
    gb = jnp.zeros((6, d_max), jnp.float32)
    gb = gb.at[0, :inner].set(params["g1"].reshape(-1))
    gb = gb.at[1, :inner].set(params["g2"].reshape(-1))
    gb = gb.at[2, :n_out].set(params["g3"].reshape(-1))        # pad gamma stays 0
    gb = gb.at[3, :inner].set(params["be1"].reshape(-1))
    gb = gb.at[4, :inner].set(params["be2"].reshape(-1))
    gb = gb.at[5, :].set(NEG_BIG)                              # pad beta -> -1e9
    gb = gb.at[5, :n_out].set(params["be3"].reshape(-1))

    meta = dict(k_in=k_in, k128=k128, inner=inner, n_out=n_out,
                out_pad=out_pad, d_max=d_max, matmul_dtype=matmul_dtype)
    return dict(w1=w1, w2=w2, w3=w3, gb=gb, meta=meta)


def _choose_block_k(k128, pad_b, inner, out_pad, d_max, itemsize, budget):
    """Largest K tile (128-multiple dividing k128) fitting the VMEM budget.

    Prefers a single grid step (block_k == k128): no per-step pipeline overhead,
    one large contiguous DMA per operand.
    """
    resident = (2 * (inner * inner + inner * out_pad) * itemsize   # w2, w3 (x2 buf)
                + 2 * 6 * d_max * 4                                # gb (x2 buf)
                + pad_b * inner * 4                                # f32 accumulator
                + 2 * pad_b * out_pad * 4                          # output (x2 buf)
                + (2 << 20))                                       # compiler headroom
    n_total = k128 // 128
    for n_k in range(1, n_total + 1):
        if n_total % n_k:
            continue
        block_k = k128 // n_k
        tile = 2 * (pad_b * block_k + block_k * inner) * itemsize  # x + w1, x2 buf
        if resident + tile <= budget:
            return n_k, block_k, resident + tile
    block_k = 128
    return n_total, block_k, resident + 2 * (pad_b + inner) * block_k * itemsize


def mlp_forward(x, prepped):
    """x: any (B, ...) array; flattened to (B, num_inputs) like the nn.Module."""
    meta = prepped["meta"]
    k_in, k128 = meta["k_in"], meta["k128"]
    inner, n_out = meta["inner"], meta["n_out"]
    out_pad, d_max = meta["out_pad"], meta["d_max"]
    mdt = meta["matmul_dtype"]
    itemsize = jnp.dtype(mdt).itemsize

    b = x.shape[0]
    # bf16 packs 16 rows per sublane group -> pad the batch to 16, not 8.
    pad_b = max(16, _ceil_to(b, 16))

    budget = _vmem_budget_bytes()
    n_k, block_k, need = _choose_block_k(k128, pad_b, inner, out_pad, d_max,
                                         itemsize, budget)
    vmem_limit = int(min(budget, max(need + (4 << 20), 16 << 20)))

    # Per-call activation prep only: cast to bf16 *before* padding, pad once.
    x2d = x.reshape(b, -1).astype(mdt)
    x_p = jnp.zeros((pad_b, k128), mdt).at[:b, :k_in].set(x2d)

    nb = jnp.array([b], jnp.int32)       # real batch size -> SMEM scalar prefetch

    out = pl.pallas_call(
        mlp_kernel,
        out_shape=jax.ShapeDtypeStruct((pad_b, out_pad), jnp.float32),
        grid_spec=pltpu.PrefetchScalarGridSpec(
            num_scalar_prefetch=1,
            grid=(n_k,),
            in_specs=[
                pl.BlockSpec((pad_b, block_k), lambda k, nb_s: (0, k)),   # x (K-tiled)
                pl.BlockSpec((block_k, inner), lambda k, nb_s: (k, 0)),   # w1 (K-tiled)
                pl.BlockSpec((inner, inner), lambda k, nb_s: (0, 0)),     # w2 resident
                pl.BlockSpec((inner, out_pad), lambda k, nb_s: (0, 0)),   # w3 resident
                pl.BlockSpec((6, d_max), lambda k, nb_s: (0, 0)),         # gamma/beta
            ],
            out_specs=pl.BlockSpec((pad_b, out_pad), lambda k, nb_s: (0, 0)),
            scratch_shapes=[pltpu.VMEM((pad_b, inner), jnp.float32)],
        ),
        compiler_params=pltpu.CompilerParams(
            dimension_semantics=("arbitrary",),    # K is a reduction axis
            vmem_limit_bytes=vmem_limit,
        ),
    )(nb, x_p, prepped["w1"], prepped["w2"], prepped["w3"], prepped["gb"])

    return out[:b, :n_out]


# --------------------------------------------------------------------------- #
# Init + pure-JAX reference
# --------------------------------------------------------------------------- #
def init_params(key, num_inputs, num_outputs, inner_dim=128):
    """PyTorch-Linear-like init; BN gamma=1, beta=0. Weights stored as (in, out)."""
    dims = [(num_inputs, inner_dim), (inner_dim, inner_dim), (inner_dim, num_outputs)]
    params = {}
    for i, (din, dout) in enumerate(dims, start=1):
        key, kw, kb = jax.random.split(key, 3)
        bound = 1.0 / jnp.sqrt(jnp.float32(din))
        params[f"w{i}"] = jax.random.uniform(kw, (din, dout), jnp.float32, -bound, bound)
        params[f"b{i}"] = jax.random.uniform(kb, (1, dout), jnp.float32, -bound, bound)
        params[f"g{i}"] = jnp.ones((1, dout), jnp.float32)
        params[f"be{i}"] = jnp.zeros((1, dout), jnp.float32)
    return params


def mlp_reference(x, params, matmul_dtype=jnp.float32):
    """Pure-JAX reference (training-mode BN; biases included — BN cancels them)."""
    h = x.reshape(x.shape[0], -1).astype(jnp.float32)
    for i in (1, 2, 3):
        w = params[f"w{i}"].astype(matmul_dtype)
        h = jnp.dot(h.astype(matmul_dtype), w,
                    preferred_element_type=jnp.float32) + params[f"b{i}"]
        mu = jnp.mean(h, axis=0, keepdims=True)
        var = jnp.mean((h - mu) ** 2, axis=0, keepdims=True)
        h = (h - mu) * jax.lax.rsqrt(var + EPS) * params[f"g{i}"] + params[f"be{i}"]
        if i < 3:
            h = jnp.maximum(h, 0.0)
    return jax.nn.softmax(h, axis=1)


if __name__ == "__main__":
    key = jax.random.PRNGKey(0)
    k_x, k_p = jax.random.split(key)

    # Small NCHW-style input: batch=2, channels=4, spatial=16x16 -> num_inputs=1024
    B, C, H, W = 2, 4, 16, 16
    num_inputs = C * H * W
    num_outputs = 10
    inner_dim = 128

    x = jax.random.normal(k_x, (B, C, H, W), jnp.float32)
    params = init_params(k_p, num_inputs, num_outputs, inner_dim)

    prepped = prepare_params(params)              # one-time weight prep (hoisted)
    out = jax.block_until_ready(mlp_forward(x, prepped))
    assert out.shape == (B, num_outputs)
    # Exact softmax normalization -> row sums are 1 up to f32 rounding.
    assert jnp.allclose(jnp.sum(out, axis=1), 1.0, atol=1e-4)

    # Compare against a reference using the same bf16 matmul precision.
    ref = mlp_reference(x, params, matmul_dtype=jnp.bfloat16)
    assert jnp.allclose(out, ref, atol=2e-3, rtol=2e-3)

    print("KERNEL_OK")
</pallas_src>

<mosaic_0001>
module attributes {stable_mosaic.version = 11 : i64} {
  func.func @mlp_kernel(%arg0: i32, %arg1: memref<1xi32, #tpu.memory_space<smem>>, %arg2: memref<16x1024xbf16, #tpu.memory_space<vmem>>, %arg3: memref<1024x128xbf16, #tpu.memory_space<vmem>>, %arg4: memref<128x128xbf16, #tpu.memory_space<vmem>>, %arg5: memref<128x128xbf16, #tpu.memory_space<vmem>>, %arg6: memref<6x128xf32, #tpu.memory_space<vmem>>, %arg7: memref<16x128xf32, #tpu.memory_space<vmem>>, %arg8: memref<16x128xf32, #tpu.memory_space<vmem>>) attributes {dimension_semantics = [#tpu.dimension_semantics<arbitrary>], iteration_bounds = array<i64: 1>, scalar_prefetch = 1 : i64, scratch_operands = 1 : i64, tpu.core_type = #tpu.core_type<tc>, window_params = [{transform_indices = @transform_0, window_bounds = array<i64: 16, 1024>}, {transform_indices = @transform_1, window_bounds = array<i64: 1024, 128>}, {pipeline_mode = #tpu.pipeline_mode<synchronous>, transform_indices = @transform_2, window_bounds = array<i64: 128, 128>}, {pipeline_mode = #tpu.pipeline_mode<synchronous>, transform_indices = @transform_3, window_bounds = array<i64: 128, 128>}, {pipeline_mode = #tpu.pipeline_mode<synchronous>, transform_indices = @transform_4, window_bounds = array<i64: 6, 128>}, {pipeline_mode = #tpu.pipeline_mode<synchronous>, transform_indices = @transform_5, window_bounds = array<i64: 16, 128>}]} {
    %c0_i32 = arith.constant 0 : i32
    %0 = arith.cmpi eq, %arg0, %c0_i32 : i32
    %1 = arith.extui %0 : i1 to i32
    %c0_i32_0 = arith.constant 0 : i32
    %2 = arith.cmpi ne, %1, %c0_i32_0 : i32
    scf.if %2 {
      %cst_10 = arith.constant 0.000000e+00 : f32
      %12 = vector.broadcast %cst_10 : f32 to vector<16x128xf32>
      %c0_11 = arith.constant 0 : index
      %c0_12 = arith.constant 0 : index
      %13 = vector.load %arg8[%c0_11, %c0_12] : memref<16x128xf32, #tpu.memory_space<vmem>>, vector<16x128xf32>
      tpu.vector_store %arg8[%c0_11, %c0_12], %12 {strides = array<i32>} : memref<16x128xf32, #tpu.memory_space<vmem>>, vector<16x128xf32>,
    } else {
    }
    %c0 = arith.constant 0 : index
    %c0_1 = arith.constant 0 : index
    %3 = vector.load %arg8[%c0, %c0_1] : memref<16x128xf32, #tpu.memory_space<vmem>>, vector<16x128xf32>
    %c0_2 = arith.constant 0 : index
    %c0_3 = arith.constant 0 : index
    %4 = vector.load %arg2[%c0_2, %c0_3] : memref<16x1024xbf16, #tpu.memory_space<vmem>>, vector<16x1024xbf16>
    %c0_4 = arith.constant 0 : index
    %c0_5 = arith.constant 0 : index
    %5 = vector.load %arg3[%c0_4, %c0_5] : memref<1024x128xbf16, #tpu.memory_space<vmem>>, vector<1024x128xbf16>
    %cst = arith.constant dense<0.000000e+00> : vector<16x128xf32>
    %6 = tpu.matmul %4, %5, %cst {dimension_numbers = #tpu.dot_dimension_numbers<[1], [0], [0], [1], [0, 0, 1, 1], [], []>} : vector<16x1024xbf16>, vector<1024x128xbf16>, vector<16x128xf32> -> vector<16x128xf32>
    %7 = arith.addf %3, %6 : vector<16x128xf32>
    %c0_6 = arith.constant 0 : index
    %c0_7 = arith.constant 0 : index
    %8 = vector.load %arg8[%c0_6, %c0_7] : memref<16x128xf32, #tpu.memory_space<vmem>>, vector<16x128xf32>
    tpu.vector_store %arg8[%c0_6, %c0_7], %7 {strides = array<i32>} : memref<16x128xf32, #tpu.memory_space<vmem>>, vector<16x128xf32>,
    %c0_i32_8 = arith.constant 0 : i32
    %9 = arith.cmpi eq, %arg0, %c0_i32_8 : i32
    %10 = arith.extui %9 : i1 to i32
    %c0_i32_9 = arith.constant 0 : i32
    %11 = arith.cmpi ne, %10, %c0_i32_9 : i32
    scf.if %11 {
      %c0_10 = arith.constant 0 : index
      %12 = memref.load %arg1[%c0_10] : memref<1xi32, #tpu.memory_space<smem>>
      %13 = arith.sitofp %12 : i32 to f32
      %cst_11 = arith.constant 1.000000e+00 : f32
      %14 = arith.divf %cst_11, %13 : f32
      %15 = tpu.iota {dimensions = array<i32: 0>} : vector<16x1xi32>
      %16 = vector.broadcast %12 : i32 to vector<16x1xi32>
      %17 = arith.cmpi slt, %15, %16 : vector<16x1xi32>
      %18 = arith.extui %17 : vector<16x1xi1> to vector<16x1xi32>
      %19 = arith.sitofp %18 : vector<16x1xi32> to vector<16x1xf32>
      %c0_12 = arith.constant 0 : index
      %c0_13 = arith.constant 0 : index
      %20 = vector.load %arg6[%c0_12, %c0_13] : memref<6x128xf32, #tpu.memory_space<vmem>>, vector<1x128xf32>
      %c3 = arith.constant 3 : index
      %c0_14 = arith.constant 0 : index
      %21 = vector.load %arg6[%c3, %c0_14] : memref<6x128xf32, #tpu.memory_space<vmem>>, vector<1x128xf32>
      %c1 = arith.constant 1 : index
      %c0_15 = arith.constant 0 : index
      %22 = vector.load %arg6[%c1, %c0_15] : memref<6x128xf32, #tpu.memory_space<vmem>>, vector<1x128xf32>
      %c4 = arith.constant 4 : index
      %c0_16 = arith.constant 0 : index
      %23 = vector.load %arg6[%c4, %c0_16] : memref<6x128xf32, #tpu.memory_space<vmem>>, vector<1x128xf32>
      %c2 = arith.constant 2 : index
      %c0_17 = arith.constant 0 : index
      %24 = vector.load %arg6[%c2, %c0_17] : memref<6x128xf32, #tpu.memory_space<vmem>>, vector<1x128xf32>
      %c5 = arith.constant 5 : index
      %c0_18 = arith.constant 0 : index
      %25 = vector.load %arg6[%c5, %c0_18] : memref<6x128xf32, #tpu.memory_space<vmem>>, vector<1x128xf32>
      %c0_19 = arith.constant 0 : index
      %c0_20 = arith.constant 0 : index
      %26 = vector.load %arg8[%c0_19, %c0_20] : memref<16x128xf32, #tpu.memory_space<vmem>>, vector<16x128xf32>
      %cst_21 = arith.constant dense<0.000000e+00> : vector<128xf32>
      %27 = vector.multi_reduction <add>, %26, %cst_21 [0] : vector<16x128xf32> to vector<128xf32>
      %28 = vector.shape_cast %27 : vector<128xf32> to vector<1x128xf32>
      %29 = vector.broadcast %14 : f32 to vector<1x128xf32>
      %30 = arith.mulf %28, %29 : vector<1x128xf32>
      %31 = vector.broadcast %30 : vector<1x128xf32> to vector<16x128xf32>
      %32 = arith.subf %26, %31 : vector<16x128xf32>
      %33 = vector.broadcast %19 : vector<16x1xf32> to vector<16x128xf32>
      %34 = arith.mulf %32, %33 : vector<16x128xf32>
      %35 = arith.mulf %34, %34 : vector<16x128xf32>
      %cst_22 = arith.constant dense<0.000000e+00> : vector<128xf32>
      %36 = vector.multi_reduction <add>, %35, %cst_22 [0] : vector<16x128xf32> to vector<128xf32>
      %37 = vector.shape_cast %36 : vector<128xf32> to vector<1x128xf32>
      %38 = vector.broadcast %14 : f32 to vector<1x128xf32>
      %39 = arith.mulf %37, %38 : vector<1x128xf32>
      %cst_23 = arith.constant 9.99999974E-6 : f32
      %40 = vector.broadcast %cst_23 : f32 to vector<1x128xf32>
      %41 = arith.addf %39, %40 : vector<1x128xf32>
      %42 = math.rsqrt %41 : vector<1x128xf32>
      %43 = arith.mulf %20, %42 : vector<1x128xf32>
      %44 = arith.mulf %30, %43 : vector<1x128xf32>
      %45 = arith.subf %21, %44 : vector<1x128xf32>
      %46 = vector.broadcast %43 : vector<1x128xf32> to vector<16x128xf32>
      %47 = arith.mulf %26, %46 : vector<16x128xf32>
      %48 = vector.broadcast %45 : vector<1x128xf32> to vector<16x128xf32>
      %49 = arith.addf %47, %48 : vector<16x128xf32>
      %cst_24 = arith.constant 0.000000e+00 : f32
      %50 = vector.broadcast %cst_24 : f32 to vector<16x128xf32>
      %51 = arith.maximumf %49, %50 : vector<16x128xf32>
      %52 = vector.broadcast %19 : vector<16x1xf32> to vector<16x128xf32>
      %53 = arith.mulf %51, %52 : vector<16x128xf32>
      %54 = arith.truncf %53 : vector<16x128xf32> to vector<16x128xbf16>
      %c0_25 = arith.constant 0 : index
      %c0_26 = arith.constant 0 : index
      %55 = vector.load %arg4[%c0_25, %c0_26] : memref<128x128xbf16, #tpu.memory_space<vmem>>, vector<128x128xbf16>
      %cst_27 = arith.constant dense<0.000000e+00> : vector<16x128xf32>
      %56 = tpu.matmul %54, %55, %cst_27 {dimension_numbers = #tpu.dot_dimension_numbers<[1], [0], [0], [1], [0, 0, 1, 1], [], []>} : vector<16x128xbf16>, vector<128x128xbf16>, vector<16x128xf32> -> vector<16x128xf32>
      %cst_28 = arith.constant dense<0.000000e+00> : vector<128xf32>
      %57 = vector.multi_reduction <add>, %56, %cst_28 [0] : vector<16x128xf32> to vector<128xf32>
      %58 = vector.shape_cast %57 : vector<128xf32> to vector<1x128xf32>
      %59 = vector.broadcast %14 : f32 to vector<1x128xf32>
      %60 = arith.mulf %58, %59 : vector<1x128xf32>
      %61 = vector.broadcast %60 : vector<1x128xf32> to vector<16x128xf32>
      %62 = arith.subf %56, %61 : vector<16x128xf32>
      %63 = vector.broadcast %19 : vector<16x1xf32> to vector<16x128xf32>
      %64 = arith.mulf %62, %63 : vector<16x128xf32>
      %65 = arith.mulf %64, %64 : vector<16x128xf32>
      %cst_29 = arith.constant dense<0.000000e+00> : vector<128xf32>
      %66 = vector.multi_reduction <add>, %65, %cst_29 [0] : vector<16x128xf32> to vector<128xf32>
      %67 = vector.shape_cast %66 : vector<128xf32> to vector<1x128xf32>
      %68 = vector.broadcast %14 : f32 to vector<1x128xf32>
      %69 = arith.mulf %67, %68 : vector<1x128xf32>
      %cst_30 = arith.constant 9.99999974E-6 : f32
      %70 = vector.broadcast %cst_30 : f32 to vector<1x128xf32>
      %71 = arith.addf %69, %70 : vector<1x128xf32>
      %72 = math.rsqrt %71 : vector<1x128xf32>
      %73 = arith.mulf %22, %72 : vector<1x128xf32>
      %74 = arith.mulf %60, %73 : vector<1x128xf32>
      %75 = arith.subf %23, %74 : vector<1x128xf32>
      %76 = vector.broadcast %73 : vector<1x128xf32> to vector<16x128xf32>
      %77 = arith.mulf %56, %76 : vector<16x128xf32>
      %78 = vector.broadcast %75 : vector<1x128xf32> to vector<16x128xf32>
      %79 = arith.addf %77, %78 : vector<16x128xf32>
      %cst_31 = arith.constant 0.000000e+00 : f32
      %80 = vector.broadcast %cst_31 : f32 to vector<16x128xf32>
      %81 = arith.maximumf %79, %80 : vector<16x128xf32>
      %82 = vector.broadcast %19 : vector<16x1xf32> to vector<16x128xf32>
      %83 = arith.mulf %81, %82 : vector<16x128xf32>
      %84 = arith.truncf %83 : vector<16x128xf32> to vector<16x128xbf16>
      %c0_32 = arith.constant 0 : index
      %c0_33 = arith.constant 0 : index
      %85 = vector.load %arg5[%c0_32, %c0_33] : memref<128x128xbf16, #tpu.memory_space<vmem>>, vector<128x128xbf16>
      %cst_34 = arith.constant dense<0.000000e+00> : vector<16x128xf32>
      %86 = tpu.matmul %84, %85, %cst_34 {dimension_numbers = #tpu.dot_dimension_numbers<[1], [0], [0], [1], [0, 0, 1, 1], [], []>} : vector<16x128xbf16>, vector<128x128xbf16>, vector<16x128xf32> -> vector<16x128xf32>
      %cst_35 = arith.constant dense<0.000000e+00> : vector<128xf32>
      %87 = vector.multi_reduction <add>, %86, %cst_35 [0] : vector<16x128xf32> to vector<128xf32>
      %88 = vector.shape_cast %87 : vector<128xf32> to vector<1x128xf32>
      %89 = vector.broadcast %14 : f32 to vector<1x128xf32>
      %90 = arith.mulf %88, %89 : vector<1x128xf32>
      %91 = vector.broadcast %90 : vector<1x128xf32> to vector<16x128xf32>
      %92 = arith.subf %86, %91 : vector<16x128xf32>
      %93 = vector.broadcast %19 : vector<16x1xf32> to vector<16x128xf32>
      %94 = arith.mulf %92, %93 : vector<16x128xf32>
      %95 = arith.mulf %94, %94 : vector<16x128xf32>
      %cst_36 = arith.constant dense<0.000000e+00> : vector<128xf32>
      %96 = vector.multi_reduction <add>, %95, %cst_36 [0] : vector<16x128xf32> to vector<128xf32>
      %97 = vector.shape_cast %96 : vector<128xf32> to vector<1x128xf32>
      %98 = vector.broadcast %14 : f32 to vector<1x128xf32>
      %99 = arith.mulf %97, %98 : vector<1x128xf32>
      %cst_37 = arith.constant 9.99999974E-6 : f32
      %100 = vector.broadcast %cst_37 : f32 to vector<1x128xf32>
      %101 = arith.addf %99, %100 : vector<1x128xf32>
      %102 = math.rsqrt %101 : vector<1x128xf32>
      %103 = arith.mulf %24, %102 : vector<1x128xf32>
      %104 = arith.mulf %90, %103 : vector<1x128xf32>
      %105 = arith.subf %25, %104 : vector<1x128xf32>
      %106 = vector.broadcast %103 : vector<1x128xf32> to vector<16x128xf32>
      %107 = arith.mulf %86, %106 : vector<16x128xf32>
      %108 = vector.broadcast %105 : vector<1x128xf32> to vector<16x128xf32>
      %109 = arith.addf %107, %108 : vector<16x128xf32>
      %cst_38 = arith.constant dense<0xFF800000> : vector<16xf32>
      %110 = vector.multi_reduction <maximumf>, %109, %cst_38 [1] : vector<16x128xf32> to vector<16xf32>
      %111 = vector.shape_cast %110 : vector<16xf32> to vector<16x1xf32>
      %112 = vector.broadcast %111 : vector<16x1xf32> to vector<16x128xf32>
      %113 = arith.subf %109, %112 : vector<16x128xf32>
      %114 = math.exp %113 : vector<16x128xf32>
      %cst_39 = arith.constant dense<0.000000e+00> : vector<16xf32>
      %115 = vector.multi_reduction <add>, %114, %cst_39 [1] : vector<16x128xf32> to vector<16xf32>
      %116 = vector.shape_cast %115 : vector<16xf32> to vector<16x1xf32>
      %117 = vector.broadcast %116 : vector<16x1xf32> to vector<16x128xf32>
      %118 = arith.divf %114, %117 : vector<16x128xf32>
      %c0_40 = arith.constant 0 : index
      %c0_41 = arith.constant 0 : index
      %119 = vector.load %arg7[%c0_40, %c0_41] : memref<16x128xf32, #tpu.memory_space<vmem>>, vector<16x128xf32>
      tpu.vector_store %arg7[%c0_40, %c0_41], %118 {strides = array<i32>} : memref<16x128xf32, #tpu.memory_space<vmem>>, vector<16x128xf32>,
    } else {
    }
    return
  }
  func.func @transform_0(%arg0: i32, %arg1: memref<1xi32, #tpu.memory_space<smem>>) -> (i32, i32) {
    %c0_i32 = arith.constant 0 : i32
    %c0_i32_0 = arith.constant 0 : i32
    return %c0_i32, %arg0 : i32, i32
  }
  func.func @transform_1(%arg0: i32, %arg1: memref<1xi32, #tpu.memory_space<smem>>) -> (i32, i32) {
    %c0_i32 = arith.constant 0 : i32
    %c0_i32_0 = arith.constant 0 : i32
    return %arg0, %c0_i32 : i32, i32
  }
  func.func @transform_2(%arg0: i32, %arg1: memref<1xi32, #tpu.memory_space<smem>>) -> (i32, i32) {
    %c0_i32 = arith.constant 0 : i32
    %c0_i32_0 = arith.constant 0 : i32
    %c0_i32_1 = arith.constant 0 : i32
    return %c0_i32, %c0_i32_0 : i32, i32
  }
  func.func @transform_3(%arg0: i32, %arg1: memref<1xi32, #tpu.memory_space<smem>>) -> (i32, i32) {
    %c0_i32 = arith.constant 0 : i32
    %c0_i32_0 = arith.constant 0 : i32
    %c0_i32_1 = arith.constant 0 : i32
    return %c0_i32, %c0_i32_0 : i32, i32
  }
  func.func @transform_4(%arg0: i32, %arg1: memref<1xi32, #tpu.memory_space<smem>>) -> (i32, i32) {
    %c0_i32 = arith.constant 0 : i32
    %c0_i32_0 = arith.constant 0 : i32
    %c0_i32_1 = arith.constant 0 : i32
    return %c0_i32, %c0_i32_0 : i32, i32
  }
  func.func @transform_5(%arg0: i32, %arg1: memref<1xi32, #tpu.memory_space<smem>>) -> (i32, i32) {
    %c0_i32 = arith.constant 0 : i32
    %c0_i32_0 = arith.constant 0 : i32
    %c0_i32_1 = arith.constant 0 : i32
    return %c0_i32, %c0_i32_0 : i32, i32
  }
}

</mosaic_0001>

<bundles_post_ra>
// kernel: tpu_custom_call.1
= control target key start
LH: loop header
LB: loop body
LE: loop exit
PB: predicated region body
PF: predicated region fallthrough
CT: control target
= control target key end

     0   :  { %12 = vsyncpa [#allocation6], 0  ;;  %s1881_s0 = inlined_call_operand.<no memory space> [shape: s32[1], index: 0, kind: input, shape index: {}]   ;;  %s1882_s1 = inlined_call_operand.hbm [shape: bf16[16,1024], index: 1, kind: input, shape index: {}]   ;;  %s1883_s2 = inlined_call_operand.hbm [shape: bf16[1024,128], index: 2, kind: input, shape index: {}]   ;;  %s1884_s3 = inlined_call_operand.hbm [shape: bf16[128,128], index: 3, kind: input, shape index: {}]   ;;  %s1885_s4 = inlined_call_operand.hbm [shape: bf16[128,128], index: 4, kind: input, shape index: {}]   ;;  %s1886_s5 = inlined_call_operand.vmem [shape: f32[6,128], index: 5, kind: input, shape index: {}]   ;;  %s1887_s6 = inlined_call_operand.hbm [shape: f32[16,128], index: 6, kind: output, shape index: {}]  }
   0x1   :  { %13 = vsyncpa [#allocation9], 0 }
   0x2   :  { %14 = vsyncpa [#allocation12], 0 }
   0x3   :  { %15 = vsyncpa [#allocation7], 0  ;;  %s1683_s21 = smov [#allocation8]   ;;  %s1565_s25 = scalar_lea.hbm %s1883_s2, 8192 }
   0x4   :  { %s33_s22 = sshll.u32 %s1683_s21, 4  ;;  %p1566_p0 = scmp.ne.s32.totalorder %s1883_s2, %s1565_s25  ;;  %s34_s22 = int_to_ptr.vmem [resolvable:$true] %s33_s22 }
   0x5   :  { %p1569_p1 = scmp.lt.u32.totalorder %s1565_s25, %s1883_s2 }
   0x7   :  { %p1571_p2 = pnand %p1569_p1, %p1566_p0 }
   0x9   :  { %1574 = shalt.err (!%p1571_p2)
}
   0xa   :  { %s1575_s30 = scalar_lea.vmem %s34_s22, 8192  ;;  %p1580_p4 = scmp.lt.s32.totalorder %s34_s22, %s34_s22 }
   0xb   :  { %p1576_p3 = scmp.ne.s32.totalorder %s34_s22, %s1575_s30  ;;  %p1581_p5 = scmp.lt.s32.totalorder %s1575_s30, %s1575_s30 }
   0xd   :  { %p1582_p6 = por %p1581_p5, %p1580_p4 }
   0xf   :  { %p1583_p7 = pnand %p1582_p6, %p1576_p3 }
  0x11   :  { %1586 = shalt.err (!%p1583_p7)
}
  0x12   :  { %s1684_s7 = smov 64   ;;  %s1685_s8 = smov 4  }
  0x13   :  { %39 = dma.hbm_to_vmem [thread:$0]  %s1883_s2, 8192, %s34_s22, [#allocation9], %s1684_s7, %s1684_s7, %s1685_s8  }
  0x14   :  { %s1686_s11 = smov [#allocation5]   ;;  %s1587_s15 = scalar_lea.hbm %s1882_s1, 1024 }
  0x15   :  { %s21_s12 = sshll.u32 %s1686_s11, 4  ;;  %p1588_p8 = scmp.ne.s32.totalorder %s1882_s1, %s1587_s15  ;;  %s22_s12 = int_to_ptr.vmem [resolvable:$true] %s21_s12 }
  0x16   :  { %p1591_p9 = scmp.lt.u32.totalorder %s1587_s15, %s1882_s1 }
  0x18   :  { %p1593_p10 = pnand %p1591_p9, %p1588_p8 }
  0x1a   :  { %1596 = shalt.err (!%p1593_p10)
}
  0x1b   :  { %s1597_s20 = scalar_lea.vmem %s22_s12, 1024  ;;  %p1602_p12 = scmp.lt.s32.totalorder %s22_s12, %s22_s12 }
  0x1c   :  { %p1598_p11 = scmp.ne.s32.totalorder %s22_s12, %s1597_s20  ;;  %p1603_p13 = scmp.lt.s32.totalorder %s1597_s20, %s1597_s20 }
  0x1e   :  { %p1604_p0 = por %p1603_p13, %p1602_p12 }
  0x20   :  { %p1605_p1 = pnand %p1604_p0, %p1598_p11 }
  0x22   :  { %1608 = shalt.err (!%p1605_p1)
}
  0x23   :  { %s1687_s2 = smov 512   ;;  %s1688_s21 = smov 32  }
  0x24   :  { %27 = dma.hbm_to_vmem [thread:$0]  %s1882_s1, 1024, %s22_s12, [#allocation6], %s1687_s2, %s1687_s2, %s1688_s21  }
  0x25   :  { %s1689_s24 = smov [#allocation10]   ;;  %s1690_s26 = smov [#allocation11]  }
  0x26   :  { %s45_s25 = sshll.u32 %s1689_s24, 4  ;;  %s57_s27 = sshll.u32 %s1690_s26, 4  ;;  %s46_s25 = int_to_ptr.vmem [resolvable:$true] %s45_s25  ;;  %s1758_s27 = int_to_ptr.vmem [resolvable:$true] %s57_s27 }
  0x27   :  { %s1609_s30 = scalar_lea.hbm %s1884_s3, 1024 }
  0x28   :  { %p1610_p2 = scmp.ne.s32.totalorder %s1884_s3, %s1609_s30  ;;  %p1613_p3 = scmp.lt.u32.totalorder %s1609_s30, %s1884_s3 }
  0x2a   :  { %p1615_p4 = pnand %p1613_p3, %p1610_p2 }
  0x2c   :  { %1618 = shalt.err (!%p1615_p4)
}
  0x2d   :  { %s1619_s1 = scalar_lea.vmem %s46_s25, 1024  ;;  %p1624_p6 = scmp.lt.s32.totalorder %s46_s25, %s46_s25 }
  0x2e   :  { %p1620_p5 = scmp.ne.s32.totalorder %s46_s25, %s1619_s1  ;;  %p1625_p7 = scmp.lt.s32.totalorder %s1619_s1, %s1619_s1 }
  0x30   :  { %p1626_p8 = por %p1625_p7, %p1624_p6 }
  0x32   :  { %p1627_p9 = pnand %p1626_p8, %p1620_p5 }
  0x34   :  { %1630 = shalt.err (!%p1627_p9)
}
  0x35   :  { %51 = dma.hbm_to_vmem [thread:$0]  %s1884_s3, 1024, %s46_s25, [#allocation9], %s1684_s7, %s1684_s7, %s1685_s8  }
  0x36   :  { %s1631_s17 = scalar_lea.hbm %s1885_s4, 1024 }
  0x37   :  { %p1632_p10 = scmp.ne.s32.totalorder %s1885_s4, %s1631_s17  ;;  %p1635_p11 = scmp.lt.u32.totalorder %s1631_s17, %s1885_s4 }
  0x39   :  { %p1637_p12 = pnand %p1635_p11, %p1632_p10 }
  0x3b   :  { %1640 = shalt.err (!%p1637_p12)
}
  0x3c   :  { %s1641_s21 = scalar_lea.vmem %s1758_s27, 1024  ;;  %p1646_p0 = scmp.lt.s32.totalorder %s1758_s27, %s1758_s27 }
  0x3d   :  { %p1642_p13 = scmp.ne.s32.totalorder %s1758_s27, %s1641_s21  ;;  %p1647_p1 = scmp.lt.s32.totalorder %s1641_s21, %s1641_s21 }
  0x3f   :  { %p1648_p2 = por %p1647_p1, %p1646_p0 }
  0x41   :  { %p1649_p3 = pnand %p1648_p2, %p1642_p13 }
  0x43   :  { %1652 = shalt.err (!%p1649_p3)
}
  0x44   :  { %63 = dma.hbm_to_vmem [thread:$0]  %s1885_s4, 1024, %s1758_s27, [#allocation12], %s1684_s7, %s1684_s7, %s1685_s8  }
  0x45   :  { %1675 = dma.done.wait [#allocation6], 1024  }
  0x46   :  { %1676 = vsyncadd [#allocation6], 4294966272 }
  0x47   :  { %1677 = dma.done.wait [#allocation9], 9216  }
  0x48   :  { %1678 = vsyncadd [#allocation9], 4294958080 }
  0x49   :  { %1679 = dma.done.wait [#allocation12], 1024  }
  0x4a   :  { %1680 = vsyncadd [#allocation12], 4294966272  ;;  %v1469_v0 = vld [vmem:[#allocation8 + $0x40] sm:$0xff]   ;;  %v1473_v4 = vld [vmem:[#allocation8 + $0x48] sm:$0xff]   ;;  %s819_s8 = scvt.s32.f32 %s1881_s0  ;;  %vm1692_vm0 = vmmov 0  }
  0x4b   :  { %v1470_v1 = vld [vmem:[#allocation8 + $0xc0] sm:$0xff]   ;;  %1308 = vmatprep.subr.bf16.mxu0 %v1469_v0  ;;  %v1474_v5 = vld [vmem:[#allocation8 + $0xc8] sm:$0xff]   ;;  %v1477_v8 = vld [vmem:[#allocation8 + $0x50] sm:$0xff]  }
  0x4c   :  { %v1471_v2 = vld [vmem:[#allocation8] sm:$0xff]   ;;  %1330 = vmatprep.subr.bf16.mxu1 %v1470_v1  ;;  %v1475_v6 = vld [vmem:[#allocation8 + $0x8] sm:$0xff]   ;;  %v1478_v9 = vld [vmem:[#allocation8 + $0xd0] sm:$0xff]  }
  0x4d   :  { %v1472_v3 = vld [vmem:[#allocation8 + $0x80] sm:$0xff]   ;;  %1309 = vmatpush3.bf16.msra.mxu0 %v1471_v2  ;;  %v1476_v7 = vld [vmem:[#allocation8 + $0x88] sm:$0xff]   ;;  %v1479_v10 = vld [vmem:[#allocation8 + $0x10] sm:$0xff]  }
  0x4e   :  { %1331 = vmatpush3.bf16.msra.mxu1 %v1472_v3  ;;  %1310 = vmatprep.subr.bf16.mxu0 %v1473_v4  ;;  %v1480_v11 = vld [vmem:[#allocation8 + $0x90] sm:$0xff]   ;;  %v1481_v12 = vld [vmem:[#allocation8 + $0x58] sm:$0xff]   ;;  %v1485_v16 = vld [vmem:[#allocation8 + $0x60] sm:$0xff]  }
  0x4f   :  { %1332 = vmatprep.subr.bf16.mxu1 %v1474_v5  ;;  %v1482_v13 = vld [vmem:[#allocation8 + $0xd8] sm:$0xff]   ;;  %v1486_v17 = vld [vmem:[#allocation8 + $0xe0] sm:$0xff]   ;;  %v1489_v20 = vld [vmem:[#allocation8 + $0x68] sm:$0xff]  }
  0x50   :  { %v1483_v14 = vld [vmem:[#allocation8 + $0x18] sm:$0xff]   ;;  %v1487_v18 = vld [vmem:[#allocation8 + $0x20] sm:$0xff]   ;;  %v1490_v21 = vld [vmem:[#allocation8 + $0xe8] sm:$0xff]  }
  0x51   :  { %1311 = vmatpush3.bf16.msra.mxu0 %v1475_v6  ;;  %v1484_v15 = vld [vmem:[#allocation8 + $0x98] sm:$0xff]   ;;  %v1488_v19 = vld [vmem:[#allocation8 + $0xa0] sm:$0xff]   ;;  %v1491_v22 = vld [vmem:[#allocation8 + $0x28] sm:$0xff]  }
  0x52   :  { %1333 = vmatpush3.bf16.msra.mxu1 %v1476_v7  ;;  %1312 = vmatprep.subr.bf16.mxu0 %v1477_v8  ;;  %v1492_v23 = vld [vmem:[#allocation8 + $0xa8] sm:$0xff]   ;;  %v1493_v24 = vld [vmem:[#allocation8 + $0x70] sm:$0xff]   ;;  %v1497_v28 = vld [vmem:[#allocation8 + $0x78] sm:$0xff]  }
  0x53   :  { %1334 = vmatprep.subr.bf16.mxu1 %v1478_v9  ;;  %v1494_v25 = vld [vmem:[#allocation8 + $0xf0] sm:$0xff]   ;;  %v1498_v29 = vld [vmem:[#allocation8 + $0xf8] sm:$0xff]   ;;  %v87_v32 = vld [vmem:[#allocation5] sm:$0xff] }
  0x54   :  { %v1495_v26 = vld [vmem:[#allocation8 + $0x30] sm:$0xff]   ;;  %v1499_v30 = vld [vmem:[#allocation8 + $0x38] sm:$0xff]   ;;  %v91_v33 = vld [vmem:[#allocation5 + $0x20] sm:$0xff] }
  0x55   :  { %1313 = vmatpush3.bf16.msra.mxu0 %v1479_v10  ;;  %v1496_v27 = vld [vmem:[#allocation8 + $0xb0] sm:$0xff]   ;;  %v1500_v31 = vld [vmem:[#allocation8 + $0xb8] sm:$0xff]   ;;  %v88_v34 = vld [vmem:[#allocation5 + $0x8] sm:$0xff]  ;;  %v1218_v35 = vcombine.low %v87_v32, %v91_v33  ;;  %v1219_v36 = vcombine.high %v87_v32, %v91_v33 }
  0x56   :  { %1335 = vmatpush3.bf16.msra.mxu1 %v1480_v11  ;;  %1314 = vmatprep.subr.bf16.mxu0 %v1481_v12  ;;  %v92_v37 = vld [vmem:[#allocation5 + $0x28] sm:$0xff]  ;;  %v1501_v40 = vld [vmem:[#allocation8 + $0x140] sm:$0xff]   ;;  %v1509_v48 = vld [vmem:[#allocation8 + $0x150] sm:$0xff]  }
  0x57   :  { %1336 = vmatprep.subr.bf16.mxu1 %v1482_v13  ;;  %v1220_v38 = vcombine.low %v88_v34, %v92_v37  ;;  %v1221_v39 = vcombine.high %v88_v34, %v92_v37  ;;  %679 = vmatprep.mubr.bf16.mxu0 %v1219_v36  ;;  %v1502_v41 = vld [vmem:[#allocation8 + $0x1c0] sm:$0xff]   ;;  %v1505_v44 = vld [vmem:[#allocation8 + $0x148] sm:$0xff]   ;;  %v1510_v49 = vld [vmem:[#allocation8 + $0x1d0] sm:$0xff]  }
  0x58   :  { %v1503_v42 = vld [vmem:[#allocation8 + $0x100] sm:$0xff]   ;;  %v1506_v45 = vld [vmem:[#allocation8 + $0x1c8] sm:$0xff]   ;;  %v1511_v50 = vld [vmem:[#allocation8 + $0x110] sm:$0xff]  }
  0x59   :  { %1315 = vmatpush3.bf16.msra.mxu0 %v1483_v14  ;;  %720 = vmatprep.mubr.bf16.mxu1 %v1221_v39  ;;  %v1504_v43 = vld [vmem:[#allocation8 + $0x180] sm:$0xff]   ;;  %v1507_v46 = vld [vmem:[#allocation8 + $0x108] sm:$0xff]   ;;  %v1512_v51 = vld [vmem:[#allocation8 + $0x190] sm:$0xff]  }
  0x5a   :  { %1337 = vmatpush3.bf16.msra.mxu1 %v1484_v15  ;;  %1316 = vmatprep.subr.bf16.mxu0 %v1485_v16  ;;  %v1508_v47 = vld [vmem:[#allocation8 + $0x188] sm:$0xff]   ;;  %v1513_v52 = vld [vmem:[#allocation8 + $0x158] sm:$0xff]   ;;  %v1517_v56 = vld [vmem:[#allocation8 + $0x160] sm:$0xff]   ;;  %v820_v16 = vstv %s819_s8 }
  0x5b   :  { %1338 = vmatprep.subr.bf16.mxu1 %v1486_v17  ;;  %v1514_v53 = vld [vmem:[#allocation8 + $0x1d8] sm:$0xff]   ;;  %v1518_v57 = vld [vmem:[#allocation8 + $0x1e0] sm:$0xff]   ;;  %v1521_v60 = vld [vmem:[#allocation8 + $0x168] sm:$0xff]   ;;  %1549 = vrcp.f32 %v820_v16 }
  0x5c   :  { %v1515_v54 = vld [vmem:[#allocation8 + $0x118] sm:$0xff]   ;;  %v1519_v58 = vld [vmem:[#allocation8 + $0x120] sm:$0xff]   ;;  %v1522_v61 = vld [vmem:[#allocation8 + $0x1e8] sm:$0xff]  }
  0x5d   :  { %1317 = vmatpush3.bf16.msra.mxu0 %v1487_v18  ;;  %v1516_v55 = vld [vmem:[#allocation8 + $0x198] sm:$0xff]   ;;  %v1520_v59 = vld [vmem:[#allocation8 + $0x1a0] sm:$0xff]   ;;  %v1523_v62 = vld [vmem:[#allocation8 + $0x128] sm:$0xff]   ;;  %v1691_v18 = vmov 0.0  }
  0x5e   :  { %1339 = vmatpush3.bf16.msra.mxu1 %v1488_v19  ;;  %1318 = vmatprep.subr.bf16.mxu0 %v1489_v20  ;;  %v1524_v63 = vld [vmem:[#allocation8 + $0x1a8] sm:$0xff]   ;;  %v1525_v0 = vld [vmem:[#allocation8 + $0x170] sm:$0xff]   ;;  %v1529_v4 = vld [vmem:[#allocation8 + $0x178] sm:$0xff]  }
  0x5f   :  { %1340 = vmatprep.subr.bf16.mxu1 %v1490_v21  ;;  %v1526_v1 = vld [vmem:[#allocation8 + $0x1f0] sm:$0xff]   ;;  %v1530_v5 = vld [vmem:[#allocation8 + $0x1f8] sm:$0xff]   ;;  %v1533_v19 = vld [vmem:[#allocation10] sm:$0xff]  }
  0x60   :  { %v1527_v2 = vld [vmem:[#allocation8 + $0x130] sm:$0xff]   ;;  %v1531_v6 = vld [vmem:[#allocation8 + $0x138] sm:$0xff]   ;;  %v1534_v20 = vld [vmem:[#allocation10 + $0x8] sm:$0xff]  }
  0x61   :  { %1319 = vmatpush3.bf16.msra.mxu0 %v1491_v22  ;;  %v1528_v3 = vld [vmem:[#allocation8 + $0x1b0] sm:$0xff]   ;;  %v1532_v7 = vld [vmem:[#allocation8 + $0x1b8] sm:$0xff]  }
  0x62   :  { %1341 = vmatpush3.bf16.msra.mxu1 %v1492_v23  ;;  %1320 = vmatprep.subr.bf16.mxu0 %v1493_v24  ;;  %v89_v8 = vld [vmem:[#allocation5 + $0x10] sm:$0xff]  ;;  %v90_v12 = vld [vmem:[#allocation5 + $0x18] sm:$0xff]  ;;  %v1537_v23 = vld [vmem:[#allocation10 + $0x20] sm:$0xff]  }
  0x63   :  { %1342 = vmatprep.subr.bf16.mxu1 %v1494_v25  ;;  %v93_v9 = vld [vmem:[#allocation5 + $0x30] sm:$0xff]  ;;  %v94_v13 = vld [vmem:[#allocation5 + $0x38] sm:$0xff]  ;;  %v1538_v24 = vld [vmem:[#allocation10 + $0x28] sm:$0xff]  }
  0x64   :  { %v1222_v10 = vcombine.low %v89_v8, %v93_v9  ;;  %v1223_v11 = vcombine.high %v89_v8, %v93_v9  ;;  %v1224_v14 = vcombine.low %v90_v12, %v94_v13  ;;  %v1225_v15 = vcombine.high %v90_v12, %v94_v13  ;;  %v1535_v21 = vld [vmem:[#allocation10 + $0x10] sm:$0xff]   ;;  %v1536_v22 = vld [vmem:[#allocation10 + $0x18] sm:$0xff]  }
  0x65   :  { %1321 = vmatpush3.bf16.msra.mxu0 %v1495_v26  ;;  %v1550_v17 = vpop.eup %1549  ;;  %v1539_v25 = vld [vmem:[#allocation10 + $0x30] sm:$0xff]   ;;  %v1540_v26 = vld [vmem:[#allocation10 + $0x38] sm:$0xff]  }
  0x66   :  { %1343 = vmatpush3.bf16.msra.mxu1 %v1496_v27  ;;  %1322 = vmatprep.subr.bf16.mxu0 %v1497_v28  ;;  %1454 = vpush %v1550_v17 }
  0x67   :  { %1344 = vmatprep.subr.bf16.mxu1 %v1498_v29 }
  0x69   :  { %1323 = vmatpush3.bf16.msra.mxu0 %v1499_v30 }
  0x6a   :  { %1345 = vmatpush3.bf16.msra.mxu1 %v1500_v31  ;;  %1352 = vmatprep.subr.bf16.mxu0 %v1501_v40 }
  0x6b   :  { %1374 = vmatprep.subr.bf16.mxu1 %v1502_v41 }
  0x6c   :  { %680 = vmatmul.mubr.bf16.vlgmr.msra.gmra.mrb[0].mxu0 %v1218_v35 }
  0x6d   :  { %721 = vmatmul.mubr.bf16.vlgmr.msra.gmra.mrb[0].mxu1 %v1220_v38  ;;  %1353 = vmatpush3.bf16.msra.mxu0 %v1503_v42 }
  0x6e   :  { %1375 = vmatpush3.bf16.msra.mxu1 %v1504_v43  ;;  %1354 = vmatprep.subr.bf16.mxu0 %v1505_v44 }
  0x6f   :  { %1376 = vmatprep.subr.bf16.mxu1 %v1506_v45  ;;  %761 = vmatprep.mubr.bf16.mxu0 %v1223_v11 }
  0x70   :  { %802 = vmatprep.mubr.bf16.mxu1 %v1225_v15 }
  0x71   :  { %1355 = vmatpush3.bf16.msra.mxu0 %v1507_v46 }
  0x72   :  { %1377 = vmatpush3.bf16.msra.mxu1 %v1508_v47  ;;  %1356 = vmatprep.subr.bf16.mxu0 %v1509_v48 }
  0x73   :  { %1378 = vmatprep.subr.bf16.mxu1 %v1510_v49 }
  0x75   :  { %1357 = vmatpush3.bf16.msra.mxu0 %v1511_v50 }
  0x76   :  { %1379 = vmatpush3.bf16.msra.mxu1 %v1512_v51  ;;  %1358 = vmatprep.subr.bf16.mxu0 %v1513_v52 }
  0x77   :  { %1380 = vmatprep.subr.bf16.mxu1 %v1514_v53 }
  0x79   :  { %1359 = vmatpush3.bf16.msra.mxu0 %v1515_v54 }
  0x7a   :  { %1381 = vmatpush3.bf16.msra.mxu1 %v1516_v55  ;;  %1360 = vmatprep.subr.bf16.mxu0 %v1517_v56 }
  0x7b   :  { %1382 = vmatprep.subr.bf16.mxu1 %v1518_v57 }
  0x7d   :  { %1361 = vmatpush3.bf16.msra.mxu0 %v1519_v58  ;;  %v823_v58 = vlaneseq }
  0x7e   :  { %1383 = vmatpush3.bf16.msra.mxu1 %v1520_v59  ;;  %1362 = vmatprep.subr.bf16.mxu0 %v1521_v60 }
  0x7f   :  { %1384 = vmatprep.subr.bf16.mxu1 %v1522_v61  ;;  %v824_v61 = vshrl.u32 %v823_v58, 7 }
  0x81   :  { %1363 = vmatpush3.bf16.msra.mxu0 %v1523_v62 }
  0x82   :  { %1385 = vmatpush3.bf16.msra.mxu1 %v1524_v63  ;;  %1364 = vmatprep.subr.bf16.mxu0 %v1525_v0  ;;  %v825_v0 = vadd.s32 8, %v824_v61 }
  0x83   :  { %1386 = vmatprep.subr.bf16.mxu1 %v1526_v1  ;;  %v826_v1 = vstv %s1881_s0 }
  0x84   :  { %vm827_vm1 = vcmp.lt.s32.totalorder %v824_v61, %v826_v1  ;;  %vm828_vm2 = vcmp.lt.s32.totalorder %v825_v0, %v826_v1 }
  0x85   :  { %1365 = vmatpush3.bf16.msra.mxu0 %v1527_v2 }
  0x86   :  { %1387 = vmatpush3.bf16.msra.mxu1 %v1528_v3  ;;  %1366 = vmatprep.subr.bf16.mxu0 %v1529_v4 }
  0x87   :  { %1388 = vmatprep.subr.bf16.mxu1 %v1530_v5 }
  0x89   :  { %1367 = vmatpush3.bf16.msra.mxu0 %v1531_v6  ;;  %v1816_v6 = vsel %vm827_vm1, 1.0, %v1691_v18 }
  0x8a   :  { %1389 = vmatpush3.bf16.msra.mxu1 %v1532_v7  ;;  %1414 = vmatprep.subr.bf16.mxu0 %v1691_v18  ;;  %v1819_v7 = vsel %vm828_vm2, 1.0, %v1691_v18 }
  0x8b   :  { %1434 = vmatprep.subr.bf16.mxu1 %v1691_v18 }
  0x8c   :  { %762 = vmatmul.mubr.bf16.vlgmr.msra.gmra.mrb[4].mxu0 %v1222_v10 }
  0x8d   :  { %803 = vmatmul.mubr.bf16.vlgmr.msra.gmra.mrb[4].mxu1 %v1224_v14  ;;  %1415 = vmatpush3.bf16.msra.mxu0 %v1533_v19 }
  0x8e   :  { %1416 = vmatprep.subr.bf16.mxu0 %v1691_v18  ;;  %1430 = vmatprep.mubr.msk.bf16.mxu0 %vm1692_vm0, %v1691_v18 }
  0x8f   :  { %1450 = vmatprep.mubr.msk.bf16.mxu1 %vm1692_vm0, %v1691_v18 }
  0x91   :  { %1417 = vmatpush3.bf16.msra.mxu0 %v1534_v20 }
  0x92   :  { %1418 = vmatprep.subr.bf16.mxu0 %v1691_v18 }
  0x95   :  { %1419 = vmatpush3.bf16.msra.mxu0 %v1535_v21 }
  0x96   :  { %1420 = vmatprep.subr.bf16.mxu0 %v1691_v18 }
  0x97   :  { %s1455_s23 = spop %1454 }
  0x98   :  { %v1812_v3 = vstv %s1455_s23 }
  0x99   :  { %1421 = vmatpush3.bf16.msra.mxu0 %v1536_v22 }
  0x9a   :  { %1422 = vmatprep.subr.bf16.mxu0 %v1691_v18 }
  0x9d   :  { %1423 = vmatpush3.bf16.msra.mxu0 %v1537_v23 }
  0x9e   :  { %1424 = vmatprep.subr.bf16.mxu0 %v1691_v18 }
  0xa1   :  { %1425 = vmatpush3.bf16.msra.mxu0 %v1538_v24  ;;  %v833_v24 = vld [vmem:[%s1886_s5] sm:$0x1] }
  0xa2   :  { %1426 = vmatprep.subr.bf16.mxu0 %v1691_v18 }
  0xa5   :  { %1427 = vmatpush3.bf16.msra.mxu0 %v1539_v25  ;;  %v1827_v25 = vsub.s32 0, %v824_v61 }
  0xa6   :  { %1428 = vmatprep.subr.bf16.mxu0 %v1691_v18 }
  0xa9   :  { %1429 = vmatpush3.bf16.msra.mxu0 %v1540_v26 }
 0x13f   :  { %v1324_v27 = vpop.f32.mrb[0].mxu0 }
 0x140   :  { %v1346_v28 = vpop.f32.mrb[0].mxu1  ;;  %v1325_v29 = vpop.f32.mrb[1].mxu0 }
 0x141   :  { %v1326_v30 = vadd.f32 %v1325_v29, %v1324_v27  ;;  %v1347_v31 = vpop.f32.mrb[1].mxu1  ;;  %v1327_v32 = vpop.f32.mrb[2].mxu0 }
 0x142   :  { %v1348_v33 = vadd.f32 %v1347_v31, %v1346_v28  ;;  %v1349_v34 = vpop.f32.mrb[2].mxu1  ;;  %v1328_v35 = vpop.f32.mrb[3].mxu0  ;;  %v834_v28 = vld [vmem:[%s1886_s5 + $0x3] sm:$0x1] }
 0x143   :  { %v1329_v36 = vadd.f32 %v1328_v35, %v1327_v32  ;;  %v1350_v37 = vpop.f32.mrb[3].mxu1 }
 0x144   :  { %v723_v38 = vadd.f32 %v1348_v33, %v1326_v30  ;;  %v1351_v39 = vadd.f32 %v1350_v37, %v1349_v34 }
 0x146   :  { %v726_v40 = vadd.f32 %v1351_v39, %v1329_v36 }
 0x15f   :  { %v1368_v41 = vpop.f32.mrb[4].mxu0 }
 0x160   :  { %v1390_v42 = vpop.f32.mrb[4].mxu1  ;;  %v1369_v43 = vpop.f32.mrb[5].mxu0 }
 0x161   :  { %v1370_v44 = vadd.f32 %v1369_v43, %v1368_v41  ;;  %v1391_v45 = vpop.f32.mrb[5].mxu1  ;;  %v1371_v46 = vpop.f32.mrb[6].mxu0  ;;  %v1542_v43 = vld [vmem:[#allocation11 + $0x8] sm:$0xff]  }
 0x162   :  { %v1392_v47 = vadd.f32 %v1391_v45, %v1390_v42  ;;  %v1393_v48 = vpop.f32.mrb[6].mxu1  ;;  %v1372_v49 = vpop.f32.mrb[7].mxu0  ;;  %v1541_v42 = vld [vmem:[#allocation11] sm:$0xff]   ;;  %v1544_v45 = vld [vmem:[#allocation11 + $0x18] sm:$0xff]  }
 0x163   :  { %v764_v50 = vadd.f32 %v1370_v44, %v723_v38  ;;  %v1373_v51 = vadd.f32 %v1372_v49, %v1371_v46  ;;  %v1394_v52 = vpop.f32.mrb[7].mxu1  ;;  %1435 = vmatpush3.bf16.msra.mxu1 %v1541_v42  ;;  %v1543_v44 = vld [vmem:[#allocation11 + $0x10] sm:$0xff]   ;;  %v1545_v46 = vld [vmem:[#allocation11 + $0x20] sm:$0xff]   ;;  %v1548_v49 = vld [vmem:[#allocation11 + $0x38] sm:$0xff]  }
 0x164   :  { %v1395_v53 = vadd.f32 %v1394_v52, %v1393_v48  ;;  %1436 = vmatprep.subr.bf16.mxu1 %v1691_v18  ;;  %v1547_v48 = vld [vmem:[#allocation11 + $0x30] sm:$0xff]  }
 0x165   :  { %v805_v54 = vadd.f32 %v1392_v47, %v764_v50  ;;  %v767_v55 = vadd.f32 %v1373_v51, %v726_v40  ;;  %v1546_v47 = vld [vmem:[#allocation11 + $0x28] sm:$0xff]  }
 0x167   :  { %v808_v56 = vadd.f32 %v1395_v53, %v767_v55  ;;  %1437 = vmatpush3.bf16.msra.mxu1 %v1542_v43 }
 0x168   :  { %1438 = vmatprep.subr.bf16.mxu1 %v1691_v18 }
 0x169   :  { %v841_v57 = vadd.f32 %v808_v56, %v805_v54 }
 0x16b   :  { %v842_v59 = vrot.slane %v841_v57, 4  ;;  %1439 = vmatpush3.bf16.msra.mxu1 %v1543_v44 }
 0x16c   :  { %1440 = vmatprep.subr.bf16.mxu1 %v1691_v18 }
 0x16d   :  { %v843_v60 = vadd.f32 %v842_v59, %v841_v57 }
 0x16f   :  { %v844_v62 = vrot.slane %v843_v60, 2  ;;  %1441 = vmatpush3.bf16.msra.mxu1 %v1544_v45 }
 0x170   :  { %1442 = vmatprep.subr.bf16.mxu1 %v1691_v18 }
 0x171   :  { %v845_v63 = vadd.f32 %v844_v62, %v843_v60 }
 0x173   :  { %v846_v2 = vrot.slane %v845_v63, 1  ;;  %1443 = vmatpush3.bf16.msra.mxu1 %v1545_v46 }
 0x174   :  { %1444 = vmatprep.subr.bf16.mxu1 %v1691_v18 }
 0x175   :  { %v847_v4 = vadd.f32 %v846_v2, %v845_v63 }
 0x177   :  { %v849_v5 = vmul.f32 %v1812_v3, %v847_v4  ;;  %1445 = vmatpush3.bf16.msra.mxu1 %v1546_v47 }
 0x178   :  { %1446 = vmatprep.subr.bf16.mxu1 %v1691_v18 }
 0x179   :  { %v850_v8 = vsub.f32 %v805_v54, %v849_v5  ;;  %v851_v9 = vsub.f32 %v808_v56, %v849_v5 }
 0x17b   :  { %v852_v10 = vmul.f32 %v1816_v6, %v850_v8  ;;  %v853_v11 = vmul.f32 %v1819_v7, %v851_v9  ;;  %1447 = vmatpush3.bf16.msra.mxu1 %v1547_v48 }
 0x17c   :  { %1448 = vmatprep.subr.bf16.mxu1 %v1691_v18 }
 0x17d   :  { %v854_v12 = vmul.f32 %v852_v10, %v852_v10  ;;  %v855_v13 = vmul.f32 %v853_v11, %v853_v11 }
 0x17f   :  { %v856_v14 = vadd.f32 %v855_v13, %v854_v12  ;;  %1449 = vmatpush3.bf16.msra.mxu1 %v1548_v49 }
 0x181   :  { %v857_v15 = vrot.slane %v856_v14, 4 }
 0x183   :  { %v858_v16 = vadd.f32 %v857_v15, %v856_v14  ;;  %v835_v15 = vld [vmem:[%s1886_s5 + $0x1] sm:$0x1] }
 0x185   :  { %v859_v17 = vrot.slane %v858_v16, 2 }
 0x187   :  { %v860_v19 = vadd.f32 %v859_v17, %v858_v16 }
 0x189   :  { %v861_v20 = vrot.slane %v860_v19, 1 }
 0x18b   :  { %v862_v21 = vadd.f32 %v861_v20, %v860_v19  ;;  %v836_v19 = vld [vmem:[%s1886_s5 + $0x4] sm:$0x1] }
 0x18d   :  { %v863_v22 = vmul.f32 %v862_v21, %v1812_v3 }
 0x18f   :  { %v864_v23 = vadd.f32 1e-05, %v863_v22 }
 0x191   :  { %1551 = vrsqrt.f32 %v864_v23 }
 0x19b   :  { %v1552_v26 = vpop.eup %1551 }
 0x19c   :  { %v866_v27 = vmul.f32 %v1552_v26, %v833_v24 }
 0x19e   :  { %v867_v29 = vmul.f32 %v866_v27, %v849_v5  ;;  %v872_v30 = vrot.slane %v866_v27, %v1827_v25 }
 0x1a0   :  { %v868_v31 = vsub.f32 %v834_v28, %v867_v29  ;;  %v873_v32 = vmul.f32 %v872_v30, %v805_v54  ;;  %v874_v33 = vmul.f32 %v872_v30, %v808_v56 }
 0x1a2   :  { %v878_v34 = vrot.slane %v868_v31, %v1827_v25 }
 0x1a4   :  { %v879_v35 = vadd.f32 %v878_v34, %v873_v32  ;;  %v880_v36 = vadd.f32 %v878_v34, %v874_v33 }
 0x1a6   :  { %v881_v37 = vmax.f32 %v879_v35, 0.0  ;;  %v882_v38 = vmax.f32 %v880_v36, 0.0 }
 0x1a8   :  { %v883_v39 = vmul.f32 %v1816_v6, %v881_v37  ;;  %v884_v40 = vmul.f32 %v1819_v7, %v882_v38 }
 0x1aa   :  { %v885_v41 = vpack.c.bf16 %v884_v40, %v883_v39 }
 0x1ac   :  { %1431 = vmatmul.mubr.bf16.vlgmr.msra.gmra.mrb[8].mxu0 %v885_v41 }
 0x27f   :  { %v984_v50 = vpop.f32.mrb[8].mxu0 }
 0x280   :  { %v1432_v51 = vpop.f32.mrb[9].mxu0 }
 0x281   :  { %v987_v52 = vpop.f32.mrb[10].mxu0 }
 0x282   :  { %v991_v53 = vadd.f32 %v987_v52, %v984_v50  ;;  %v1433_v54 = vpop.f32.mrb[11].mxu0 }
 0x284   :  { %v992_v55 = vrot.slane %v991_v53, 4 }
 0x286   :  { %v993_v56 = vadd.f32 %v992_v55, %v991_v53 }
 0x288   :  { %v994_v57 = vrot.slane %v993_v56, 2 }
 0x28a   :  { %v995_v58 = vadd.f32 %v994_v57, %v993_v56 }
 0x28c   :  { %v996_v59 = vrot.slane %v995_v58, 1 }
 0x28e   :  { %v997_v60 = vadd.f32 %v996_v59, %v995_v58 }
 0x290   :  { %v998_v61 = vmul.f32 %v997_v60, %v1812_v3 }
 0x292   :  { %v999_v62 = vsub.f32 %v984_v50, %v998_v61  ;;  %v1000_v63 = vsub.f32 %v987_v52, %v998_v61 }
 0x294   :  { %v1001_v0 = vmul.f32 %v1816_v6, %v999_v62  ;;  %v1002_v18 = vmul.f32 %v1819_v7, %v1000_v63 }
 0x296   :  { %v1003_v1 = vmul.f32 %v1001_v0, %v1001_v0  ;;  %v1004_v2 = vmul.f32 %v1002_v18, %v1002_v18 }
 0x298   :  { %v1005_v4 = vadd.f32 %v1004_v2, %v1003_v1 }
 0x29a   :  { %v1006_v5 = vrot.slane %v1005_v4, 4 }
 0x29c   :  { %v1007_v8 = vadd.f32 %v1006_v5, %v1005_v4 }
 0x29e   :  { %v1008_v9 = vrot.slane %v1007_v8, 2 }
 0x2a0   :  { %v1009_v10 = vadd.f32 %v1008_v9, %v1007_v8 }
 0x2a2   :  { %v1010_v11 = vrot.slane %v1009_v10, 1 }
 0x2a4   :  { %v1011_v12 = vadd.f32 %v1010_v11, %v1009_v10 }
 0x2a6   :  { %v1012_v13 = vmul.f32 %v1011_v12, %v1812_v3 }
 0x2a8   :  { %v1013_v14 = vadd.f32 1e-05, %v1012_v13 }
 0x2aa   :  { %1553 = vrsqrt.f32 %v1013_v14 }
 0x2b4   :  { %v1554_v16 = vpop.eup %1553 }
 0x2b5   :  { %v1015_v17 = vmul.f32 %v1554_v16, %v835_v15 }
 0x2b7   :  { %v1016_v20 = vmul.f32 %v1015_v17, %v998_v61  ;;  %v1021_v21 = vrot.slane %v1015_v17, %v1827_v25  ;;  %v837_v61 = vld [vmem:[%s1886_s5 + $0x2] sm:$0x1] }
 0x2b9   :  { %v1017_v22 = vsub.f32 %v836_v19, %v1016_v20  ;;  %v1022_v23 = vmul.f32 %v1021_v21, %v984_v50  ;;  %v1023_v24 = vmul.f32 %v1021_v21, %v987_v52 }
 0x2bb   :  { %v1027_v26 = vrot.slane %v1017_v22, %v1827_v25 }
 0x2bd   :  { %v1028_v27 = vadd.f32 %v1027_v26, %v1022_v23  ;;  %v1029_v28 = vadd.f32 %v1027_v26, %v1023_v24 }
 0x2bf   :  { %v1030_v29 = vmax.f32 %v1028_v27, 0.0  ;;  %v1031_v30 = vmax.f32 %v1029_v28, 0.0 }
 0x2c1   :  { %v1033_v31 = vmul.f32 %v1819_v7, %v1031_v30  ;;  %v1032_v32 = vmul.f32 %v1816_v6, %v1030_v29 }
 0x2c3   :  { %v1034_v33 = vpack.c.bf16 %v1033_v31, %v1032_v32 }
 0x2c5   :  { %1451 = vmatmul.mubr.bf16.vlgmr.msra.gmra.mrb[8].mxu1 %v1034_v33 }
 0x398   :  { %v1133_v34 = vpop.f32.mrb[8].mxu1 }
 0x399   :  { %v1452_v35 = vpop.f32.mrb[9].mxu1 }
 0x39a   :  { %v1136_v36 = vpop.f32.mrb[10].mxu1 }
 0x39b   :  { %v1140_v37 = vadd.f32 %v1136_v36, %v1133_v34  ;;  %v1453_v38 = vpop.f32.mrb[11].mxu1 }
 0x39d   :  { %v1141_v39 = vrot.slane %v1140_v37, 4 }
 0x39f   :  { %v1142_v40 = vadd.f32 %v1141_v39, %v1140_v37 }
 0x3a1   :  { %v1143_v41 = vrot.slane %v1142_v40, 2 }
 0x3a3   :  { %v1144_v42 = vadd.f32 %v1143_v41, %v1142_v40 }
 0x3a5   :  { %v1145_v43 = vrot.slane %v1144_v42, 1 }
 0x3a7   :  { %v1146_v44 = vadd.f32 %v1145_v43, %v1144_v42 }
 0x3a9   :  { %v1147_v45 = vmul.f32 %v1146_v44, %v1812_v3 }
 0x3ab   :  { %v1148_v46 = vsub.f32 %v1133_v34, %v1147_v45  ;;  %v1149_v47 = vsub.f32 %v1136_v36, %v1147_v45 }
 0x3ad   :  { %v1150_v48 = vmul.f32 %v1816_v6, %v1148_v46  ;;  %v1151_v49 = vmul.f32 %v1819_v7, %v1149_v47  ;;  %v838_v7 = vld [vmem:[%s1886_s5 + $0x5] sm:$0x1]  ;;  %s1693_s5 = smov [#allocation13]  }
 0x3ae   :  { %s1204_s14 = sshll.u32 %s1693_s5, 4  ;;  %s1205_s14 = int_to_ptr.vmem [resolvable:$true] %s1204_s14 }
 0x3af   :  { %v1152_v50 = vmul.f32 %v1150_v48, %v1150_v48  ;;  %v1153_v51 = vmul.f32 %v1151_v49, %v1151_v49  ;;  %s1653_s15 = scalar_lea.vmem %s1205_s14, 256  ;;  %p1658_p5 = scmp.lt.s32.totalorder %s1205_s14, %s1205_s14 }
 0x3b0   :  { %p1654_p4 = scmp.ne.s32.totalorder %s1205_s14, %s1653_s15  ;;  %p1659_p6 = scmp.lt.s32.totalorder %s1653_s15, %s1653_s15 }
 0x3b1   :  { %v1154_v52 = vadd.f32 %v1153_v51, %v1152_v50 }
 0x3b2   :  { %p1660_p7 = por %p1659_p6, %p1658_p5 }
 0x3b3   :  { %v1155_v53 = vrot.slane %v1154_v52, 4 }
 0x3b4   :  { %p1661_p8 = pnand %p1660_p7, %p1654_p4 }
 0x3b5   :  { %v1156_v54 = vadd.f32 %v1155_v53, %v1154_v52 }
 0x3b7   :  { %v1157_v55 = vrot.slane %v1156_v54, 2 }
 0x3b9   :  { %v1158_v56 = vadd.f32 %v1157_v55, %v1156_v54 }
 0x3bb   :  { %v1159_v57 = vrot.slane %v1158_v56, 1 }
 0x3bd   :  { %v1160_v58 = vadd.f32 %v1159_v57, %v1158_v56 }
 0x3bf   :  { %v1161_v59 = vmul.f32 %v1160_v58, %v1812_v3 }
 0x3c1   :  { %v1162_v60 = vadd.f32 1e-05, %v1161_v59 }
 0x3c3   :  { %1555 = vrsqrt.f32 %v1162_v60 }
 0x3cd   :  { %v1556_v6 = vpop.eup %1555 }
 0x3ce   :  { %v1164_v62 = vmul.f32 %v1556_v6, %v837_v61 }
 0x3d0   :  { %v1165_v63 = vmul.f32 %v1164_v62, %v1147_v45  ;;  %v1170_v0 = vrot.slane %v1164_v62, %v1827_v25 }
 0x3d2   :  { %v1166_v18 = vsub.f32 %v838_v7, %v1165_v63  ;;  %v1171_v1 = vmul.f32 %v1170_v0, %v1133_v34  ;;  %v1172_v2 = vmul.f32 %v1170_v0, %v1136_v36 }
 0x3d4   :  { %v1176_v3 = vrot.slane %v1166_v18, %v1827_v25 }
 0x3d6   :  { %v1177_v4 = vadd.f32 %v1176_v3, %v1171_v1  ;;  %v1178_v5 = vadd.f32 %v1176_v3, %v1172_v2 }
 0x3d8   :  { %1179 = vmax.xlane.f32.xlu0 %v1177_v4 }
 0x3dc   :  { %1181 = vmax.xlane.f32.xlu0 %v1178_v5 }
 0x465   :  { %v1180_v8 = vpop.xlane.xlu0 %1179 }
 0x466   :  { %v1183_v9 = vsub.f32 %v1177_v4, %v1180_v8 }
 0x468   :  { %v1185_v10 = vmul.f32 1.442695, %v1183_v9 }
 0x469   :  { %v1182_v11 = vpop.xlane.xlu0 %1181 }
 0x46a   :  { %1557 = vpow2.f32 %v1185_v10  ;;  %v1184_v12 = vsub.f32 %v1178_v5, %v1182_v11 }
 0x46c   :  { %v1187_v13 = vmul.f32 1.442695, %v1184_v12 }
 0x46e   :  { %1559 = vpow2.f32 %v1187_v13 }
 0x474   :  { %v1558_v14 = vpop.eup %1557 }
 0x475   :  { %1189 = vadd.xlane.f32.xlu1 %v1558_v14 }
 0x478   :  { %v1560_v15 = vpop.eup %1559 }
 0x479   :  { %1191 = vadd.xlane.f32.xlu1 %v1560_v15 }
 0x502   :  { %v1190_v16 = vpop.xlane.xlu1 %1189 }
 0x503   :  { %1561 = vrcp.f32 %v1190_v16 }
 0x506   :  { %v1192_v17 = vpop.xlane.xlu1 %1191 }
 0x507   :  { %1563 = vrcp.f32 %v1192_v17 }
 0x50d   :  { %v1562_v25 = vpop.eup %1561 }
 0x50e   :  { %v1194_v19 = vmul.f32 %v1562_v25, %v1558_v14 }
 0x510   :  { %1197 = vst [vmem:[#allocation13] sm:$0xff] %v1194_v19 }
 0x511   :  { %v1564_v20 = vpop.eup %1563 }
 0x512   :  { %v1196_v21 = vmul.f32 %v1564_v20, %v1560_v15 }
 0x514   :  { %1198 = vst [vmem:[#allocation13 + $0x8] sm:$0xff] %v1196_v21 }
 0x515   :  { %1664 = shalt.err (!%p1661_p8)
}
 0x516   :  { %s1665_s18 = scalar_lea.hbm %s1887_s6, 256 }
 0x517   :  { %p1666_p9 = scmp.ne.s32.totalorder %s1887_s6, %s1665_s18  ;;  %p1669_p10 = scmp.lt.u32.totalorder %s1665_s18, %s1887_s6 }
 0x519   :  { %p1671_p11 = pnand %p1669_p10, %p1666_p9 }
 0x51b   :  { %1674 = shalt.err (!%p1671_p11)
}
 0x51c   :  { %s1694_s3 = smov 128   ;;  %s1695_s22 = smov 8  }
 0x51d   :  { %1210 = dma.vmem_to_hbm [thread:$0]  %s1205_s14, 256, %s1887_s6, [#allocation7], %s1694_s3, %s1694_s3, %s1695_s22  }
 0x51e   :  { %1681 = dma.done.wait [#allocation7], 256  }
 0x51f   :  { %1682 = vsyncadd [#allocation7], 4294967040 }
 0x520   :  { %1214 = vsyncpa [#allocation6], 1 }
 0x521   :  { %1215 = vsyncpa [#allocation9], 1 }
 0x522   :  { %1216 = vsyncpa [#allocation12], 1 }
 0x523   :  { %1217 = vsyncpa [#allocation7], 1 }

</bundles_post_ra>
